<compile_context>
chip_gen: v5e
topology: v5e:2x2
jax: 0.10.0
libtpu: 0.0.40
codegen_flags: <defaults>
</compile_context>

<pallas_src>
import functools
import math

import jax
import jax.numpy as jnp
from jax import lax
from jax.experimental import pallas as pl
from jax.experimental.pallas import tpu as pltpu


def _round_up(x, m):
    return ((x + m - 1) // m) * m


# ---------------------------------------------------------------------------
# Path A: small vocab -- one-hot @ table on the MXU, table resident in VMEM.
# ---------------------------------------------------------------------------
def _embed_onehot_kernel(ids_ref, table_ref, out_ref, *, scale):
    # ids_ref:   (1, TB)   int32     VMEM (lane-friendly 2-D block)
    # table_ref: (V, Dp)   f32/bf16  VMEM (full table, constant index_map)
    # out_ref:   (TB, Dp)  f32/bf16  VMEM (lane-dense: Dp % 128 == 0)
    ids = ids_ref[0, :]                                      # (TB,)
    tb = ids.shape[0]
    vocab = table_ref.shape[0]
    col = lax.broadcasted_iota(jnp.int32, (tb, vocab), 1)
    # One-hot in the table dtype: 0/1 is exact in bf16, so a bf16 table gets
    # the bf16-native MXU path; accumulation stays in f32 either way.
    onehot = (ids[:, None] == col).astype(table_ref.dtype)
    emb = jnp.dot(onehot, table_ref[...], preferred_element_type=jnp.float32)
    out_ref[...] = (emb * scale).astype(out_ref.dtype)


def _embed_onehot(ids, table, token_blk, num_blocks, scale):
    n_pad = ids.shape[0]
    vocab, d_pad = table.shape
    ids2d = ids.reshape(num_blocks, token_blk)
    kernel = functools.partial(_embed_onehot_kernel, scale=scale)
    return pl.pallas_call(
        kernel,
        out_shape=jax.ShapeDtypeStruct((n_pad, d_pad), table.dtype),
        grid_spec=pltpu.PrefetchScalarGridSpec(
            num_scalar_prefetch=0,
            grid=(num_blocks,),
            in_specs=[
                pl.BlockSpec((1, token_blk), lambda i: (i, 0)),
                # Constant index_map: the table block never changes, so the
                # pipeline fetches it once.  The path-selection heuristic in
                # the wrapper budgets 2x its size for pipeline buffering.
                pl.BlockSpec((vocab, d_pad), lambda i: (0, 0)),
            ],
            out_specs=pl.BlockSpec((token_blk, d_pad), lambda i: (i, 0)),
        ),
        compiler_params=pltpu.CompilerParams(
            dimension_semantics=("parallel",),
            vmem_limit_bytes=32 * 1024 * 1024,
        ),
    )(ids2d, table)


# ---------------------------------------------------------------------------
# Path B: general vocab -- DMA row gather from HBM (memory-bound roofline).
# ---------------------------------------------------------------------------
def _embed_gather_kernel(ids_smem, table_hbm, out_ref, rows_vmem, copy_sem,
                         *, scale, token_blk):
    # ids_smem:  (n_pad,)   int32     SMEM (scalar prefetch)
    # table_hbm: (V, Dp)    f32/bf16  HBM  (memory_space=pl.ANY, never copied whole)
    # out_ref:   (TB, Dp)             VMEM (lane-dense output tile)
    # rows_vmem: (TB, Dp)             VMEM staging buffer
    # copy_sem:  ()                   DMA semaphore
    base = pl.program_id(0) * token_blk

    def _issue(t, carry):
        tok = ids_smem[base + t]
        pltpu.make_async_copy(
            table_hbm.at[pl.ds(tok, 1), :],
            rows_vmem.at[pl.ds(t, 1), :],
            copy_sem,
        ).start()
        return carry

    # Issue all token_blk row copies: they are all in flight concurrently,
    # which is what keeps HBM busy (no MXU, no (TB, vocab) intermediate).
    lax.fori_loop(0, token_blk, _issue, 0)

    def _drain(t, carry):
        # The wait descriptor only needs the per-row transfer size; it does
        # not have to match the source row of any particular started copy.
        pltpu.make_async_copy(
            table_hbm.at[pl.ds(0, 1), :],
            rows_vmem.at[pl.ds(0, 1), :],
            copy_sem,
        ).wait()
        return carry

    lax.fori_loop(0, token_blk, _drain, 0)

    out_ref[...] = (rows_vmem[...].astype(jnp.float32) * scale).astype(out_ref.dtype)


def _embed_gather(ids, table, token_blk, num_blocks, scale):
    n_pad = ids.shape[0]
    _, d_pad = table.shape
    kernel = functools.partial(_embed_gather_kernel, scale=scale,
                               token_blk=token_blk)
    return pl.pallas_call(
        kernel,
        out_shape=jax.ShapeDtypeStruct((n_pad, d_pad), table.dtype),
        grid_spec=pltpu.PrefetchScalarGridSpec(
            num_scalar_prefetch=1,                       # ids -> SMEM
            grid=(num_blocks,),
            in_specs=[pl.BlockSpec(memory_space=pl.ANY)],  # table stays in HBM
            out_specs=pl.BlockSpec((token_blk, d_pad),
                                   lambda i, ids_ref: (i, 0)),
            scratch_shapes=[
                pltpu.VMEM((token_blk, d_pad), table.dtype),
                pltpu.SemaphoreType.DMA(()),
            ],
        ),
        compiler_params=pltpu.CompilerParams(
            dimension_semantics=("parallel",),
            vmem_limit_bytes=32 * 1024 * 1024,
        ),
    )(ids, table)


# ---------------------------------------------------------------------------
# Wrapper: padding, token blocking, path selection.
# ---------------------------------------------------------------------------
def input_embeddings(x, table, *, token_blk=256, method=None):
    """forward(x) = table[x] * sqrt(d_model).

    x:     (batch, seq) integer token ids, all in [0, vocab_size).
    table: (vocab_size, d_model) embedding matrix (float32 or bfloat16).
    """
    batch, seq = x.shape
    vocab, d_model = table.shape
    scale = float(math.sqrt(d_model))        # scale uses the *unpadded* d_model

    # Lane-dense output: pad d_model up to a multiple of 128 (no-op if already).
    d_pad = _round_up(d_model, 128)
    table_p = table if d_pad == d_model else jnp.pad(
        table, ((0, 0), (0, d_pad - d_model)))

    # Token blocking: >=128 tokens per grid step; pad the flat id stream with
    # token id 0 and slice the padding off the output afterwards.
    n_tok = batch * seq
    tb = max(128, min(_round_up(token_blk, 128), _round_up(n_tok, 128)))
    n_pad = _round_up(n_tok, tb)
    ids = x.reshape(n_tok).astype(jnp.int32)
    if n_pad != n_tok:
        ids = jnp.pad(ids, (0, n_pad - n_tok))
    num_blocks = n_pad // tb

    if method is None:
        # Resident-table (one-hot) path only if 2x table (pipeline buffers)
        # plus the (TB, vocab) one-hot fit comfortably in scoped VMEM on every
        # chip generation (v7x: 64 MiB physical / 32 MiB default scoped per TC,
        # duplicated per core under megacore).  Otherwise: HBM gather.
        itemsize = table_p.dtype.itemsize
        resident_bytes = 2 * vocab * d_pad * itemsize + tb * vocab * itemsize
        method = "onehot" if resident_bytes <= (8 << 20) else "gather"

    if method == "onehot":
        out = _embed_onehot(ids, table_p, tb, num_blocks, scale)
    elif method == "gather":
        out = _embed_gather(ids, table_p, tb, num_blocks, scale)
    else:
        raise ValueError(f"unknown method: {method}")

    return out[:n_tok, :d_model].reshape(batch, seq, d_model)


if __name__ == "__main__":
    # Small shapes consistent with the module's forward (lane-dense d_model).
    d_model = 128
    vocab_size = 512
    batch, seq = 2, 8

    key = jax.random.PRNGKey(0)
    k_tab, k_ids = jax.random.split(key)

    # nn.Embedding default init: N(0, 1)
    table = jax.random.normal(k_tab, (vocab_size, d_model), dtype=jnp.float32)
    x = jax.random.randint(k_ids, (batch, seq), 0, vocab_size, dtype=jnp.int32)

    ref = table[x] * jnp.float32(math.sqrt(d_model))

    # Path A: small-vocab one-hot MXU path (table resident in VMEM).
    out_onehot = jax.block_until_ready(input_embeddings(x, table, method="onehot"))
    assert out_onehot.shape == (batch, seq, d_model)
    assert jnp.allclose(out_onehot, ref, atol=1e-5, rtol=1e-5)

    # Path B: general HBM row-gather (scalar-prefetched ids + per-row DMAs).
    out_gather = jax.block_until_ready(input_embeddings(x, table, method="gather"))
    assert out_gather.shape == (batch, seq, d_model)
    assert jnp.allclose(out_gather, ref, atol=1e-5, rtol=1e-5)

    # bf16 table exercises the bf16-native MXU one-hot path (lossless one-hot,
    # table values quantized to bf16 by the caller's choice of dtype).
    table_bf16 = table.astype(jnp.bfloat16)
    out_bf16 = jax.block_until_ready(input_embeddings(x, table_bf16, method="onehot"))
    ref_bf16 = table_bf16.astype(jnp.float32)[x] * jnp.float32(math.sqrt(d_model))
    assert jnp.allclose(out_bf16.astype(jnp.float32), ref_bf16, atol=5e-2, rtol=2e-2)

    print("KERNEL_OK")
</pallas_src>

<mosaic_0001>
module attributes {stable_mosaic.version = 11 : i64} {
  func.func @_embed_onehot_kernel(%arg0: i32, %arg1: memref<1x128xi32, #tpu.memory_space<vmem>>, %arg2: memref<512x128xf32, #tpu.memory_space<vmem>>, %arg3: memref<128x128xf32, #tpu.memory_space<vmem>>) attributes {dimension_semantics = [#tpu.dimension_semantics<parallel>], iteration_bounds = array<i64: 1>, scalar_prefetch = 0 : i64, scratch_operands = 0 : i64, tpu.core_type = #tpu.core_type<tc>, window_params = [{transform_indices = @transform_0, window_bounds = array<i64: 1, 128>}, {pipeline_mode = #tpu.pipeline_mode<synchronous>, transform_indices = @transform_1, window_bounds = array<i64: 512, 128>}, {transform_indices = @transform_2, window_bounds = array<i64: 128, 128>}]} {
    %c0 = arith.constant 0 : index
    %c0_0 = arith.constant 0 : index
    %0 = vector.load %arg1[%c0, %c0_0] : memref<1x128xi32, #tpu.memory_space<vmem>>, vector<1x128xi32>
    %1 = vector.shape_cast %0 : vector<1x128xi32> to vector<128xi32>
    %2 = tpu.iota {dimensions = array<i32: 1>} : vector<128x512xi32>
    %3 = vector.shape_cast %1 : vector<128xi32> to vector<128x1xi32>
    %4 = vector.broadcast %3 : vector<128x1xi32> to vector<128x512xi32>
    %5 = arith.cmpi eq, %4, %2 : vector<128x512xi32>
    %6 = arith.extui %5 : vector<128x512xi1> to vector<128x512xi32>
    %7 = arith.sitofp %6 : vector<128x512xi32> to vector<128x512xf32>
    %c0_1 = arith.constant 0 : index
    %c0_2 = arith.constant 0 : index
    %8 = vector.load %arg2[%c0_1, %c0_2] : memref<512x128xf32, #tpu.memory_space<vmem>>, vector<512x128xf32>
    %cst = arith.constant dense<0.000000e+00> : vector<128x128xf32>
    %9 = tpu.matmul %7, %8, %cst {dimension_numbers = #tpu.dot_dimension_numbers<[1], [0], [0], [1], [0, 0, 1, 1], [], []>} : vector<128x512xf32>, vector<512x128xf32>, vector<128x128xf32> -> vector<128x128xf32>
    %cst_3 = arith.constant 11.3137083 : f32
    %10 = vector.broadcast %cst_3 : f32 to vector<128x128xf32>
    %11 = arith.mulf %9, %10 : vector<128x128xf32>
    %c0_4 = arith.constant 0 : index
    %c0_5 = arith.constant 0 : index
    %12 = vector.load %arg3[%c0_4, %c0_5] : memref<128x128xf32, #tpu.memory_space<vmem>>, vector<128x128xf32>
    tpu.vector_store %arg3[%c0_4, %c0_5], %11 {strides = array<i32>} : memref<128x128xf32, #tpu.memory_space<vmem>>, vector<128x128xf32>,
    return
  }
  func.func @transform_0(%arg0: i32) -> (i32, i32) {
    %c0_i32 = arith.constant 0 : i32
    %c0_i32_0 = arith.constant 0 : i32
    return %arg0, %c0_i32 : i32, i32
  }
  func.func @transform_1(%arg0: i32) -> (i32, i32) {
    %c0_i32 = arith.constant 0 : i32
    %c0_i32_0 = arith.constant 0 : i32
    %c0_i32_1 = arith.constant 0 : i32
    return %c0_i32, %c0_i32_0 : i32, i32
  }
  func.func @transform_2(%arg0: i32) -> (i32, i32) {
    %c0_i32 = arith.constant 0 : i32
    %c0_i32_0 = arith.constant 0 : i32
    return %arg0, %c0_i32 : i32, i32
  }
}

</mosaic_0001>

<bundles_post_ra>
// kernel: tpu_custom_call.1
= control target key start
LH: loop header
LB: loop body
LE: loop exit
PB: predicated region body
PF: predicated region fallthrough
CT: control target
= control target key end

     0   :  { %7 = vsyncpa [#allocation3], 0  ;;  %s1156_s0 = inlined_call_operand.hbm [shape: s32[1,128], index: 0, kind: input, shape index: {}]   ;;  %s1157_s1 = inlined_call_operand.hbm [shape: f32[512,128], index: 1, kind: input, shape index: {}]   ;;  %s1158_s2 = inlined_call_operand.hbm [shape: f32[128,128], index: 2, kind: output, shape index: {}]  }
   0x1   :  { %8 = vsyncpa [#allocation6], 0 }
   0x2   :  { %9 = vsyncpa [#allocation4], 0  ;;  %s15_s11 = sshll.u32 %s1156_s0, 4  ;;  %s943_s12 = smov [#allocation2]   ;;  %s16_s11 = int_to_ptr.hbm [resolvable:$true] %s15_s11 }
   0x3   :  { %s17_s13 = sshll.u32 %s943_s12, 4  ;;  %s25_s16 = sshll.u32 %s1157_s1, 4  ;;  %s18_s13 = int_to_ptr.vmem [resolvable:$true] %s17_s13  ;;  %s26_s16 = int_to_ptr.hbm [resolvable:$true] %s25_s16 }
   0x4   :  { %20 = dma.hbm_to_vmem [thread:$0]  %s16_s11, 16, %s18_s13, [#allocation3]  }
   0x5   :  { %s944_s17 = smov [#allocation5]   ;;  %s945_s19 = smov 128  }
   0x6   :  { %s27_s18 = sshll.u32 %s944_s17, 4  ;;  %s946_s20 = smov 8   ;;  %s28_s18 = int_to_ptr.vmem [resolvable:$true] %s27_s18 }
   0x7   :  { %33 = dma.hbm_to_vmem [thread:$0]  %s26_s16, 8192, %s28_s18, [#allocation6], %s945_s19, %s945_s19, %s946_s20  }
   0x8   :  { %937 = dma.done.wait [#allocation3], 16  }
   0x9   :  { %938 = vsyncadd [#allocation3], 4294967280 }
   0xa   :  { %939 = dma.done.wait [#allocation6], 8192  }
   0xb   :  { %940 = vsyncadd [#allocation6], 4294959104  ;;  %v43_v0 = vlaneseq  ;;  %v979_v4 = vld [vmem:[#allocation2] ss:$0 sm:$0xff]  ;;  %v351_v12 = vld [vmem:[#allocation5 + $0x70] sm:$0xff]  ;;  %s948_s0 = smov [#allocation7]  }
   0xc   :  { %v352_v8 = vld [vmem:[#allocation5 + $0x78] sm:$0xff]  ;;  %v367_v13 = vld [vmem:[#allocation5 + $0xf0] sm:$0xff]  ;;  %v350_v19 = vld [vmem:[#allocation5 + $0x68] sm:$0xff]  ;;  %s697_s1 = sshll.u32 %s948_s0, 4  ;;  %s699_s23 = sshll.u32 %s1158_s2, 4  ;;  %s698_s1 = int_to_ptr.vmem [resolvable:$true] %s697_s1  ;;  %s700_s23 = int_to_ptr.hbm [resolvable:$true] %s699_s23 }
   0xd   :  { %v974_v1 = vshrl.u32 %v43_v0, 7  ;;  %v368_v9 = vld [vmem:[#allocation5 + $0xf8] sm:$0xff]  ;;  %401 = vmatpush.msra.mxu0 %v352_v8  ;;  %v383_v15 = vld [vmem:[#allocation5 + $0x170] sm:$0xff]  ;;  %v366_v20 = vld [vmem:[#allocation5 + $0xe8] sm:$0xff] }
   0xe   :  { %v384_v10 = vld [vmem:[#allocation5 + $0x178] sm:$0xff]  ;;  %466 = vmatpush.msra.mxu1 %v368_v9  ;;  %v399_v16 = vld [vmem:[#allocation5 + $0x1f0] sm:$0xff]  ;;  %v382_v21 = vld [vmem:[#allocation5 + $0x168] sm:$0xff] }
   0xf   :  { %847 = vset.pattern.permute.xlu0 %v974_v1  ;;  %v63_v2 = vadd.s32 16, %v974_v1  ;;  %v75_v3 = vadd.s32 32, %v974_v1  ;;  %v57_v5 = vadd.s32 8, %v974_v1  ;;  %v69_v6 = vadd.s32 24, %v974_v1  ;;  %v400_v11 = vld [vmem:[#allocation5 + $0x1f8] sm:$0xff]  ;;  %531 = vmatpush.msra.mxu2 %v384_v10  ;;  %v398_v22 = vld [vmem:[#allocation5 + $0x1e8] sm:$0xff] }
  0x10   :  { %v81_v7 = vadd.s32 40, %v974_v1  ;;  %v99_v14 = vadd.s32 64, %v974_v1  ;;  %596 = vmatpush.msra.mxu3 %v400_v11  ;;  %402 = vmatpush.msra.mxu0 %v351_v12  ;;  %v87_v17 = vadd.s32 48, %v974_v1  ;;  %v93_v18 = vadd.s32 56, %v974_v1  ;;  %v349_v23 = vld [vmem:[#allocation5 + $0x60] sm:$0xff]  ;;  %v348_v27 = vld [vmem:[#allocation5 + $0x58] sm:$0xff] }
  0x11   :  { %849 = vset.pattern.permute.xlu1 %v63_v2  ;;  %851 = vset.pattern.permute.xlu2 %v75_v3  ;;  %v365_v24 = vld [vmem:[#allocation5 + $0xe0] sm:$0xff]  ;;  %v364_v28 = vld [vmem:[#allocation5 + $0xd8] sm:$0xff]  ;;  %v347_v31 = vld [vmem:[#allocation5 + $0x50] sm:$0xff]  ;;  %v105_v44 = vadd.s32 72, %v974_v1  ;;  %v111_v52 = vadd.s32 80, %v974_v1  ;;  %v129_v53 = vadd.s32 104, %v974_v1 }
  0x12   :  { %467 = vmatpush.msra.mxu1 %v367_v13  ;;  %532 = vmatpush.msra.mxu2 %v383_v15  ;;  %v381_v25 = vld [vmem:[#allocation5 + $0x160] sm:$0xff]  ;;  %v380_v29 = vld [vmem:[#allocation5 + $0x158] sm:$0xff]  ;;  %v363_v32 = vld [vmem:[#allocation5 + $0xd0] sm:$0xff]  ;;  %v117_v12 = vadd.s32 88, %v974_v1 }
  0x13   :  { %597 = vmatpush.msra.mxu3 %v399_v16  ;;  %403 = vmatpush.msra.mxu0 %v350_v19  ;;  %v397_v26 = vld [vmem:[#allocation5 + $0x1e0] sm:$0xff]  ;;  %v396_v30 = vld [vmem:[#allocation5 + $0x1d8] sm:$0xff]  ;;  %v379_v33 = vld [vmem:[#allocation5 + $0x150] sm:$0xff]  ;;  %v123_v19 = vadd.s32 96, %v974_v1 }
  0x14   :  { %468 = vmatpush.msra.mxu1 %v366_v20  ;;  %533 = vmatpush.msra.mxu2 %v382_v21  ;;  %v395_v34 = vld [vmem:[#allocation5 + $0x1d0] sm:$0xff]  ;;  %v346_v35 = vld [vmem:[#allocation5 + $0x48] sm:$0xff]  ;;  %v345_v39 = vld [vmem:[#allocation5 + $0x40] sm:$0xff]  ;;  %v1009_v20 = vand.u32 127, %v43_v0  ;;  %v141_v21 = vadd.s32 120, %v974_v1  ;;  %v947_v0 = vmov 1.0  }
  0x15   :  { %598 = vmatpush.msra.mxu3 %v398_v22  ;;  %404 = vmatpush.msra.mxu0 %v349_v23  ;;  %v362_v36 = vld [vmem:[#allocation5 + $0xc8] sm:$0xff]  ;;  %v361_v40 = vld [vmem:[#allocation5 + $0xc0] sm:$0xff]  ;;  %v344_v43 = vld [vmem:[#allocation5 + $0x38] sm:$0xff] }
  0x16   :  { %469 = vmatpush.msra.mxu1 %v365_v24  ;;  %534 = vmatpush.msra.mxu2 %v381_v25  ;;  %v378_v37 = vld [vmem:[#allocation5 + $0x148] sm:$0xff]  ;;  %v377_v41 = vld [vmem:[#allocation5 + $0x140] sm:$0xff]  ;;  %v360_v45 = vld [vmem:[#allocation5 + $0xb8] sm:$0xff]  ;;  %v1013_v22 = vadd.s32 128, %v1009_v20  ;;  %v1016_v23 = vadd.s32 256, %v1009_v20  ;;  %v1019_v24 = vadd.s32 384, %v1009_v20 }
  0x17   :  { %53 = vperm.xlu0 %847, %v979_v4   ;;  %599 = vmatpush.msra.mxu3 %v397_v26  ;;  %v394_v38 = vld [vmem:[#allocation5 + $0x1c8] sm:$0xff]  ;;  %v393_v42 = vld [vmem:[#allocation5 + $0x1c0] sm:$0xff]  ;;  %v376_v46 = vld [vmem:[#allocation5 + $0x138] sm:$0xff] }
  0x18   :  { %405 = vmatpush.msra.mxu0 %v348_v27  ;;  %470 = vmatpush.msra.mxu1 %v364_v28  ;;  %v392_v47 = vld [vmem:[#allocation5 + $0x1b8] sm:$0xff]  ;;  %v343_v48 = vld [vmem:[#allocation5 + $0x30] sm:$0xff]  ;;  %v342_v54 = vld [vmem:[#allocation5 + $0x28] sm:$0xff] }
  0x19   :  { %65 = vperm.xlu1 %849, %v979_v4   ;;  %77 = vperm.xlu2 %851, %v979_v4   ;;  %v359_v49 = vld [vmem:[#allocation5 + $0xb0] sm:$0xff]  ;;  %v358_v55 = vld [vmem:[#allocation5 + $0xa8] sm:$0xff]  ;;  %v341_v58 = vld [vmem:[#allocation5 + $0x20] sm:$0xff] }
  0x1a   :  { %535 = vmatpush.msra.mxu2 %v380_v29  ;;  %600 = vmatpush.msra.mxu3 %v396_v30  ;;  %v375_v50 = vld [vmem:[#allocation5 + $0x130] sm:$0xff]  ;;  %v374_v56 = vld [vmem:[#allocation5 + $0x128] sm:$0xff]  ;;  %v357_v59 = vld [vmem:[#allocation5 + $0xa0] sm:$0xff] }
  0x1b   :  { %406 = vmatpush.msra.mxu0 %v347_v31  ;;  %471 = vmatpush.msra.mxu1 %v363_v32  ;;  %v391_v51 = vld [vmem:[#allocation5 + $0x1b0] sm:$0xff]  ;;  %v390_v57 = vld [vmem:[#allocation5 + $0x1a8] sm:$0xff]  ;;  %v373_v60 = vld [vmem:[#allocation5 + $0x120] sm:$0xff] }
  0x1c   :  { %536 = vmatpush.msra.mxu2 %v379_v33  ;;  %601 = vmatpush.msra.mxu3 %v395_v34  ;;  %v389_v61 = vld [vmem:[#allocation5 + $0x1a0] sm:$0xff]  ;;  %v340_v62 = vld [vmem:[#allocation5 + $0x18] sm:$0xff]  ;;  %v387_v8 = vld [vmem:[#allocation5 + $0x190] sm:$0xff] }
  0x1d   :  { %407 = vmatpush.msra.mxu0 %v346_v35  ;;  %472 = vmatpush.msra.mxu1 %v362_v36  ;;  %v356_v63 = vld [vmem:[#allocation5 + $0x98] sm:$0xff]  ;;  %v338_v9 = vld [vmem:[#allocation5 + $0x8] sm:$0xff]  ;;  %v337_v15 = vld [vmem:[#allocation5] sm:$0xff] }
  0x1e   :  { %537 = vmatpush.msra.mxu2 %v378_v37  ;;  %602 = vmatpush.msra.mxu3 %v394_v38  ;;  %v372_v2 = vld [vmem:[#allocation5 + $0x118] sm:$0xff]  ;;  %v354_v10 = vld [vmem:[#allocation5 + $0x88] sm:$0xff]  ;;  %v353_v16 = vld [vmem:[#allocation5 + $0x80] sm:$0xff] }
  0x1f   :  { %848 = vset.pattern.permute.xlu0 %v57_v5  ;;  %408 = vmatpush.msra.mxu0 %v345_v39  ;;  %v388_v3 = vld [vmem:[#allocation5 + $0x198] sm:$0xff]  ;;  %v339_v5 = vld [vmem:[#allocation5 + $0x10] sm:$0xff]  ;;  %v370_v11 = vld [vmem:[#allocation5 + $0x108] sm:$0xff] }
  0x20   :  { %473 = vmatpush.msra.mxu1 %v361_v40  ;;  %538 = vmatpush.msra.mxu2 %v377_v41  ;;  %v386_v13 = vld [vmem:[#allocation5 + $0x188] sm:$0xff] }
  0x21   :  { %850 = vset.pattern.permute.xlu1 %v69_v6  ;;  %852 = vset.pattern.permute.xlu2 %v81_v7  ;;  %v355_v6 = vld [vmem:[#allocation5 + $0x90] sm:$0xff] }
  0x22   :  { %603 = vmatpush.msra.mxu3 %v393_v42  ;;  %409 = vmatpush.msra.mxu0 %v344_v43  ;;  %v371_v7 = vld [vmem:[#allocation5 + $0x110] sm:$0xff] }
  0x23   :  { %474 = vmatpush.msra.mxu1 %v360_v45  ;;  %539 = vmatpush.msra.mxu2 %v376_v46 }
  0x24   :  { %604 = vmatpush.msra.mxu3 %v392_v47  ;;  %410 = vmatpush.msra.mxu0 %v343_v48 }
  0x25   :  { %475 = vmatpush.msra.mxu1 %v359_v49  ;;  %540 = vmatpush.msra.mxu2 %v375_v50 }
  0x26   :  { %605 = vmatpush.msra.mxu3 %v391_v51  ;;  %411 = vmatpush.msra.mxu0 %v342_v54 }
  0x27   :  { %59 = vperm.xlu0 %848, %v979_v4   ;;  %476 = vmatpush.msra.mxu1 %v358_v55 }
  0x28   :  { %541 = vmatpush.msra.mxu2 %v374_v56  ;;  %606 = vmatpush.msra.mxu3 %v390_v57 }
  0x29   :  { %71 = vperm.xlu1 %850, %v979_v4   ;;  %83 = vperm.xlu2 %852, %v979_v4  }
  0x2a   :  { %412 = vmatpush.msra.mxu0 %v341_v58  ;;  %477 = vmatpush.msra.mxu1 %v357_v59 }
  0x2b   :  { %542 = vmatpush.msra.mxu2 %v373_v60  ;;  %607 = vmatpush.msra.mxu3 %v389_v61 }
  0x2c   :  { %413 = vmatpush.msra.mxu0 %v340_v62  ;;  %478 = vmatpush.msra.mxu1 %v356_v63 }
  0x2d   :  { %543 = vmatpush.msra.mxu2 %v372_v2  ;;  %608 = vmatpush.msra.mxu3 %v388_v3 }
  0x2e   :  { %414 = vmatpush.msra.mxu0 %v339_v5  ;;  %479 = vmatpush.msra.mxu1 %v355_v6 }
  0x2f   :  { %855 = vset.pattern.permute.xlu0 %v99_v14  ;;  %544 = vmatpush.msra.mxu2 %v371_v7  ;;  %v135_v14 = vadd.s32 112, %v974_v1 }
  0x30   :  { %609 = vmatpush.msra.mxu3 %v387_v8  ;;  %415 = vmatpush.msra.mxu0 %v338_v9 }
  0x31   :  { %853 = vset.pattern.permute.xlu1 %v87_v17  ;;  %854 = vset.pattern.permute.xlu2 %v93_v18  ;;  %v369_v17 = vld [vmem:[#allocation5 + $0x100] sm:$0xff] }
  0x32   :  { %480 = vmatpush.msra.mxu1 %v354_v10  ;;  %545 = vmatpush.msra.mxu2 %v370_v11  ;;  %v385_v18 = vld [vmem:[#allocation5 + $0x180] sm:$0xff] }
  0x33   :  { %610 = vmatpush.msra.mxu3 %v386_v13  ;;  %416 = vmatpush.msra.mxu0 %v337_v15 }
  0x34   :  { %481 = vmatpush.msra.mxu1 %v353_v16  ;;  %546 = vmatpush.msra.mxu2 %v369_v17 }
  0x35   :  { %611 = vmatpush.msra.mxu3 %v385_v18 }
  0x37   :  { %101 = vperm.xlu0 %855, %v979_v4  }
  0x39   :  { %89 = vperm.xlu1 %853, %v979_v4   ;;  %95 = vperm.xlu2 %854, %v979_v4  }
  0x3f   :  { %860 = vset.pattern.permute.xlu0 %v129_v53 }
  0x41   :  { %856 = vset.pattern.permute.xlu1 %v105_v44  ;;  %857 = vset.pattern.permute.xlu2 %v111_v52 }
  0x47   :  { %131 = vperm.xlu0 %860, %v979_v4  }
  0x49   :  { %107 = vperm.xlu1 %856, %v979_v4   ;;  %113 = vperm.xlu2 %857, %v979_v4  }
  0x4f   :  { %863 = vset.pattern.permute.xlu0 %v141_v21 }
  0x51   :  { %858 = vset.pattern.permute.xlu1 %v117_v12  ;;  %859 = vset.pattern.permute.xlu2 %v123_v19 }
  0x59   :  { %119 = vperm.xlu1 %858, %v979_v4   ;;  %125 = vperm.xlu2 %859, %v979_v4  }
  0x61   :  { %861 = vset.pattern.permute.xlu1 %v135_v14  ;;  %862 = vset.pattern.permute.xlu2 %v141_v21 }
  0x69   :  { %137 = vperm.xlu1 %861, %v979_v4   ;;  %143 = vperm.xlu2 %862, %v979_v4  }
  0x73   :  { %v78_v27 = vpop.permute.xlu2 %77 }
  0x83   :  { %v84_v28 = vpop.permute.xlu2 %83 }
  0x89   :  { %v54_v25 = vpop.permute.xlu0 %53 }
  0x8a   :  { %vm145_vm0 = vcmp.eq.s32.totalorder %v54_v25, %v1009_v20  ;;  %vm146_vm1 = vcmp.eq.s32.totalorder %v54_v25, %v1013_v22  ;;  %vm147_vm2 = vcmp.eq.s32.totalorder %v54_v25, %v1016_v23  ;;  %vm148_vm3 = vcmp.eq.s32.totalorder %v54_v25, %v1019_v24 }
  0x8b   :  { %777 = vmatmul.msk.f32.vlgmr.msra.gmra.mxu0 %vm145_vm0, %v947_v0  ;;  %793 = vmatmul.msk.f32.vlgmr.msra.gmra.mxu1 %vm146_vm1, %v947_v0  ;;  %v66_v26 = vpop.permute.xlu1 %65  ;;  %vm161_vm0 = vcmp.eq.s32.totalorder %v78_v27, %v1009_v20  ;;  %vm162_vm1 = vcmp.eq.s32.totalorder %v78_v27, %v1013_v22 }
  0x8c   :  { %809 = vmatmul.msk.f32.vlgmr.msra.gmra.mxu2 %vm147_vm2, %v947_v0  ;;  %825 = vmatmul.msk.f32.vlgmr.msra.gmra.mxu3 %vm148_vm3, %v947_v0  ;;  %vm153_vm8 = vcmp.eq.s32.totalorder %v66_v26, %v1009_v20  ;;  %vm154_vm9 = vcmp.eq.s32.totalorder %v66_v26, %v1013_v22  ;;  %vm155_vm10 = vcmp.eq.s32.totalorder %v66_v26, %v1016_v23 }
  0x8d   :  { %vm156_vm11 = vcmp.eq.s32.totalorder %v66_v26, %v1019_v24  ;;  %vm163_vm2 = vcmp.eq.s32.totalorder %v78_v27, %v1016_v23  ;;  %vm164_vm3 = vcmp.eq.s32.totalorder %v78_v27, %v1019_v24 }
  0x93   :  { %v96_v30 = vpop.permute.xlu2 %95 }
  0x99   :  { %v60_v1 = vpop.permute.xlu0 %59 }
  0x9a   :  { %vm149_vm4 = vcmp.eq.s32.totalorder %v60_v1, %v1009_v20  ;;  %vm150_vm5 = vcmp.eq.s32.totalorder %v60_v1, %v1013_v22  ;;  %vm151_vm6 = vcmp.eq.s32.totalorder %v60_v1, %v1016_v23  ;;  %vm152_vm7 = vcmp.eq.s32.totalorder %v60_v1, %v1019_v24 }
  0x9b   :  { %778 = vmatmul.msk.f32.gmra.mxu0 %vm149_vm4, %v947_v0  ;;  %794 = vmatmul.msk.f32.gmra.mxu1 %vm150_vm5, %v947_v0  ;;  %v72_v4 = vpop.permute.xlu1 %71  ;;  %vm165_vm4 = vcmp.eq.s32.totalorder %v84_v28, %v1009_v20  ;;  %vm166_vm5 = vcmp.eq.s32.totalorder %v84_v28, %v1013_v22 }
  0x9c   :  { %810 = vmatmul.msk.f32.gmra.mxu2 %vm151_vm6, %v947_v0  ;;  %826 = vmatmul.msk.f32.gmra.mxu3 %vm152_vm7, %v947_v0  ;;  %vm157_vm12 = vcmp.eq.s32.totalorder %v72_v4, %v1009_v20  ;;  %vm158_vm13 = vcmp.eq.s32.totalorder %v72_v4, %v1013_v22  ;;  %vm159_vm14 = vcmp.eq.s32.totalorder %v72_v4, %v1016_v23 }
  0x9d   :  { %vm160_vm15 = vcmp.eq.s32.totalorder %v72_v4, %v1019_v24  ;;  %vm167_vm6 = vcmp.eq.s32.totalorder %v84_v28, %v1016_v23  ;;  %vm168_vm7 = vcmp.eq.s32.totalorder %v84_v28, %v1019_v24 }
  0xa3   :  { %779 = vmatmul.msk.f32.gmra.mxu0 %vm153_vm8, %v947_v0  ;;  %795 = vmatmul.msk.f32.gmra.mxu1 %vm154_vm9, %v947_v0  ;;  %v114_v33 = vpop.permute.xlu2 %113 }
  0xa4   :  { %811 = vmatmul.msk.f32.gmra.mxu2 %vm155_vm10, %v947_v0  ;;  %827 = vmatmul.msk.f32.gmra.mxu3 %vm156_vm11, %v947_v0 }
  0xa9   :  { %v102_v31 = vpop.permute.xlu0 %101 }
  0xab   :  { %780 = vmatmul.msk.f32.gmra.mxu0 %vm157_vm12, %v947_v0  ;;  %796 = vmatmul.msk.f32.gmra.mxu1 %vm158_vm13, %v947_v0  ;;  %v90_v29 = vpop.permute.xlu1 %89  ;;  %vm173_vm12 = vcmp.eq.s32.totalorder %v96_v30, %v1009_v20  ;;  %vm174_vm13 = vcmp.eq.s32.totalorder %v96_v30, %v1013_v22 }
  0xac   :  { %812 = vmatmul.msk.f32.gmra.mxu2 %vm159_vm14, %v947_v0  ;;  %828 = vmatmul.msk.f32.gmra.mxu3 %vm160_vm15, %v947_v0  ;;  %vm169_vm8 = vcmp.eq.s32.totalorder %v90_v29, %v1009_v20  ;;  %vm170_vm9 = vcmp.eq.s32.totalorder %v90_v29, %v1013_v22  ;;  %vm171_vm10 = vcmp.eq.s32.totalorder %v90_v29, %v1016_v23 }
  0xad   :  { %vm172_vm11 = vcmp.eq.s32.totalorder %v90_v29, %v1019_v24  ;;  %vm175_vm14 = vcmp.eq.s32.totalorder %v96_v30, %v1016_v23  ;;  %vm176_vm15 = vcmp.eq.s32.totalorder %v96_v30, %v1019_v24 }
  0xb3   :  { %781 = vmatmul.msk.f32.gmra.mxu0 %vm161_vm0, %v947_v0  ;;  %797 = vmatmul.msk.f32.gmra.mxu1 %vm162_vm1, %v947_v0  ;;  %vm177_vm0 = vcmp.eq.s32.totalorder %v102_v31, %v1009_v20  ;;  %vm178_vm1 = vcmp.eq.s32.totalorder %v102_v31, %v1013_v22  ;;  %v126_v35 = vpop.permute.xlu2 %125 }
  0xb4   :  { %813 = vmatmul.msk.f32.gmra.mxu2 %vm163_vm2, %v947_v0  ;;  %829 = vmatmul.msk.f32.gmra.mxu3 %vm164_vm3, %v947_v0  ;;  %vm179_vm2 = vcmp.eq.s32.totalorder %v102_v31, %v1016_v23  ;;  %vm180_vm3 = vcmp.eq.s32.totalorder %v102_v31, %v1019_v24 }
  0xb9   :  { %v132_v36 = vpop.permute.xlu0 %131 }
  0xbb   :  { %782 = vmatmul.msk.f32.gmra.mxu0 %vm165_vm4, %v947_v0  ;;  %798 = vmatmul.msk.f32.gmra.mxu1 %vm166_vm5, %v947_v0  ;;  %v108_v32 = vpop.permute.xlu1 %107 }
  0xbc   :  { %814 = vmatmul.msk.f32.gmra.mxu2 %vm167_vm6, %v947_v0  ;;  %830 = vmatmul.msk.f32.gmra.mxu3 %vm168_vm7, %v947_v0  ;;  %vm181_vm4 = vcmp.eq.s32.totalorder %v108_v32, %v1009_v20  ;;  %vm182_vm5 = vcmp.eq.s32.totalorder %v108_v32, %v1013_v22  ;;  %vm183_vm6 = vcmp.eq.s32.totalorder %v108_v32, %v1016_v23 }
  0xbd   :  { %vm184_vm7 = vcmp.eq.s32.totalorder %v108_v32, %v1019_v24 }
  0xc3   :  { %783 = vmatmul.msk.f32.gmra.mxu0 %vm169_vm8, %v947_v0  ;;  %799 = vmatmul.msk.f32.gmra.mxu1 %vm170_vm9, %v947_v0  ;;  %vm185_vm8 = vcmp.eq.s32.totalorder %v114_v33, %v1009_v20  ;;  %vm186_vm9 = vcmp.eq.s32.totalorder %v114_v33, %v1013_v22  ;;  %v144_v38 = vpop.permute.xlu2 %143 }
  0xc4   :  { %815 = vmatmul.msk.f32.gmra.mxu2 %vm171_vm10, %v947_v0  ;;  %831 = vmatmul.msk.f32.gmra.mxu3 %vm172_vm11, %v947_v0  ;;  %vm187_vm10 = vcmp.eq.s32.totalorder %v114_v33, %v1016_v23  ;;  %vm188_vm11 = vcmp.eq.s32.totalorder %v114_v33, %v1019_v24 }
  0xcb   :  { %784 = vmatmul.msk.f32.gmra.mxu0 %vm173_vm12, %v947_v0  ;;  %800 = vmatmul.msk.f32.gmra.mxu1 %vm174_vm13, %v947_v0  ;;  %v120_v34 = vpop.permute.xlu1 %119 }
  0xcc   :  { %816 = vmatmul.msk.f32.gmra.mxu2 %vm175_vm14, %v947_v0  ;;  %832 = vmatmul.msk.f32.gmra.mxu3 %vm176_vm15, %v947_v0  ;;  %vm189_vm12 = vcmp.eq.s32.totalorder %v120_v34, %v1009_v20  ;;  %vm190_vm13 = vcmp.eq.s32.totalorder %v120_v34, %v1013_v22  ;;  %vm191_vm14 = vcmp.eq.s32.totalorder %v120_v34, %v1016_v23 }
  0xcd   :  { %vm192_vm15 = vcmp.eq.s32.totalorder %v120_v34, %v1019_v24 }
  0xd3   :  { %785 = vmatmul.msk.f32.gmra.mxu0 %vm177_vm0, %v947_v0  ;;  %801 = vmatmul.msk.f32.gmra.mxu1 %vm178_vm1, %v947_v0  ;;  %vm193_vm0 = vcmp.eq.s32.totalorder %v126_v35, %v1009_v20  ;;  %vm194_vm1 = vcmp.eq.s32.totalorder %v126_v35, %v1013_v22 }
  0xd4   :  { %817 = vmatmul.msk.f32.gmra.mxu2 %vm179_vm2, %v947_v0  ;;  %833 = vmatmul.msk.f32.gmra.mxu3 %vm180_vm3, %v947_v0  ;;  %vm195_vm2 = vcmp.eq.s32.totalorder %v126_v35, %v1016_v23  ;;  %vm196_vm3 = vcmp.eq.s32.totalorder %v126_v35, %v1019_v24 }
  0xdb   :  { %786 = vmatmul.msk.f32.gmra.mxu0 %vm181_vm4, %v947_v0  ;;  %802 = vmatmul.msk.f32.gmra.mxu1 %vm182_vm5, %v947_v0  ;;  %vm197_vm4 = vcmp.eq.s32.totalorder %v132_v36, %v1009_v20  ;;  %vm198_vm5 = vcmp.eq.s32.totalorder %v132_v36, %v1013_v22  ;;  %v138_v37 = vpop.permute.xlu1 %137 }
  0xdc   :  { %818 = vmatmul.msk.f32.gmra.mxu2 %vm183_vm6, %v947_v0  ;;  %834 = vmatmul.msk.f32.gmra.mxu3 %vm184_vm7, %v947_v0  ;;  %vm199_vm6 = vcmp.eq.s32.totalorder %v132_v36, %v1016_v23  ;;  %vm200_vm7 = vcmp.eq.s32.totalorder %v132_v36, %v1019_v24 }
  0xe3   :  { %787 = vmatmul.msk.f32.gmra.mxu0 %vm185_vm8, %v947_v0  ;;  %803 = vmatmul.msk.f32.gmra.mxu1 %vm186_vm9, %v947_v0  ;;  %vm201_vm8 = vcmp.eq.s32.totalorder %v138_v37, %v1009_v20  ;;  %vm202_vm9 = vcmp.eq.s32.totalorder %v138_v37, %v1013_v22 }
  0xe4   :  { %819 = vmatmul.msk.f32.gmra.mxu2 %vm187_vm10, %v947_v0  ;;  %835 = vmatmul.msk.f32.gmra.mxu3 %vm188_vm11, %v947_v0  ;;  %vm203_vm10 = vcmp.eq.s32.totalorder %v138_v37, %v1016_v23  ;;  %vm204_vm11 = vcmp.eq.s32.totalorder %v138_v37, %v1019_v24 }
  0xeb   :  { %788 = vmatmul.msk.f32.gmra.mxu0 %vm189_vm12, %v947_v0  ;;  %804 = vmatmul.msk.f32.gmra.mxu1 %vm190_vm13, %v947_v0  ;;  %vm205_vm12 = vcmp.eq.s32.totalorder %v144_v38, %v1009_v20  ;;  %vm206_vm13 = vcmp.eq.s32.totalorder %v144_v38, %v1013_v22 }
  0xec   :  { %820 = vmatmul.msk.f32.gmra.mxu2 %vm191_vm14, %v947_v0  ;;  %836 = vmatmul.msk.f32.gmra.mxu3 %vm192_vm15, %v947_v0  ;;  %vm207_vm14 = vcmp.eq.s32.totalorder %v144_v38, %v1016_v23  ;;  %vm208_vm15 = vcmp.eq.s32.totalorder %v144_v38, %v1019_v24 }
  0xf3   :  { %789 = vmatmul.msk.f32.gmra.mxu0 %vm193_vm0, %v947_v0  ;;  %805 = vmatmul.msk.f32.gmra.mxu1 %vm194_vm1, %v947_v0 }
  0xf4   :  { %821 = vmatmul.msk.f32.gmra.mxu2 %vm195_vm2, %v947_v0  ;;  %837 = vmatmul.msk.f32.gmra.mxu3 %vm196_vm3, %v947_v0 }
  0xfb   :  { %790 = vmatmul.msk.f32.gmra.mxu0 %vm197_vm4, %v947_v0  ;;  %806 = vmatmul.msk.f32.gmra.mxu1 %vm198_vm5, %v947_v0 }
  0xfc   :  { %822 = vmatmul.msk.f32.gmra.mxu2 %vm199_vm6, %v947_v0  ;;  %838 = vmatmul.msk.f32.gmra.mxu3 %vm200_vm7, %v947_v0 }
 0x103   :  { %791 = vmatmul.msk.f32.gmra.mxu0 %vm201_vm8, %v947_v0  ;;  %807 = vmatmul.msk.f32.gmra.mxu1 %vm202_vm9, %v947_v0 }
 0x104   :  { %823 = vmatmul.msk.f32.gmra.mxu2 %vm203_vm10, %v947_v0  ;;  %839 = vmatmul.msk.f32.gmra.mxu3 %vm204_vm11, %v947_v0 }
 0x108   :  { %v418_v39 = vpop.f32.mrf.mxu0  ;;  %v483_v40 = vpop.f32.mrf.mxu1 }
 0x109   :  { %v484_v41 = vadd.f32 %v483_v40, %v418_v39 }
 0x10b   :  { %792 = vmatmul.msk.f32.gmra.mxu0 %vm205_vm12, %v947_v0  ;;  %808 = vmatmul.msk.f32.gmra.mxu1 %vm206_vm13, %v947_v0 }
 0x10c   :  { %824 = vmatmul.msk.f32.gmra.mxu2 %vm207_vm14, %v947_v0  ;;  %840 = vmatmul.msk.f32.gmra.mxu3 %vm208_vm15, %v947_v0 }
 0x10f   :  { %v548_v42 = vpop.f32.mrf.mxu2  ;;  %v613_v44 = vpop.f32.mrf.mxu3 }
 0x110   :  { %v549_v43 = vadd.f32 %v548_v42, %v484_v41 }
 0x112   :  { %v614_v45 = vadd.f32 %v613_v44, %v549_v43 }
 0x114   :  { %v661_v46 = vmul.f32 11.313708, %v614_v45 }
 0x116   :  { %677 = vst [vmem:[#allocation7] sm:$0xff] %v661_v46 }
 0x118   :  { %v421_v47 = vpop.f32.mrf.mxu0  ;;  %v486_v48 = vpop.f32.mrf.mxu1 }
 0x119   :  { %v487_v49 = vadd.f32 %v486_v48, %v421_v47 }
 0x11f   :  { %v551_v50 = vpop.f32.mrf.mxu2  ;;  %v616_v51 = vpop.f32.mrf.mxu3 }
 0x120   :  { %v552_v52 = vadd.f32 %v551_v50, %v487_v49  ;;  %v424_v53 = vpop.f32.mrf.mxu0  ;;  %v489_v54 = vpop.f32.mrf.mxu1 }
 0x121   :  { %v490_v57 = vadd.f32 %v489_v54, %v424_v53 }
 0x122   :  { %v617_v55 = vadd.f32 %v616_v51, %v552_v52 }
 0x124   :  { %v662_v56 = vmul.f32 11.313708, %v617_v55 }
 0x126   :  { %678 = vst [vmem:[#allocation7 + $0x8] sm:$0xff] %v662_v56 }
 0x127   :  { %v554_v58 = vpop.f32.mrf.mxu2  ;;  %v619_v59 = vpop.f32.mrf.mxu3 }
 0x128   :  { %v555_v60 = vadd.f32 %v554_v58, %v490_v57  ;;  %v427_v61 = vpop.f32.mrf.mxu0  ;;  %v492_v62 = vpop.f32.mrf.mxu1 }
 0x129   :  { %v493_v3 = vadd.f32 %v492_v62, %v427_v61 }
 0x12a   :  { %v620_v63 = vadd.f32 %v619_v59, %v555_v60 }
 0x12c   :  { %v663_v2 = vmul.f32 11.313708, %v620_v63 }
 0x12e   :  { %679 = vst [vmem:[#allocation7 + $0x10] sm:$0xff] %v663_v2 }
 0x12f   :  { %v557_v5 = vpop.f32.mrf.mxu2  ;;  %v622_v6 = vpop.f32.mrf.mxu3 }
 0x130   :  { %v558_v7 = vadd.f32 %v557_v5, %v493_v3  ;;  %v430_v8 = vpop.f32.mrf.mxu0  ;;  %v495_v9 = vpop.f32.mrf.mxu1 }
 0x131   :  { %v496_v12 = vadd.f32 %v495_v9, %v430_v8 }
 0x132   :  { %v623_v10 = vadd.f32 %v622_v6, %v558_v7 }
 0x134   :  { %v664_v11 = vmul.f32 11.313708, %v623_v10 }
 0x136   :  { %680 = vst [vmem:[#allocation7 + $0x18] sm:$0xff] %v664_v11 }
 0x137   :  { %v560_v13 = vpop.f32.mrf.mxu2  ;;  %v625_v14 = vpop.f32.mrf.mxu3 }
 0x138   :  { %v561_v15 = vadd.f32 %v560_v13, %v496_v12  ;;  %v433_v16 = vpop.f32.mrf.mxu0  ;;  %v498_v17 = vpop.f32.mrf.mxu1 }
 0x139   :  { %v499_v20 = vadd.f32 %v498_v17, %v433_v16 }
 0x13a   :  { %v626_v18 = vadd.f32 %v625_v14, %v561_v15 }
 0x13c   :  { %v665_v19 = vmul.f32 11.313708, %v626_v18 }
 0x13e   :  { %681 = vst [vmem:[#allocation7 + $0x20] sm:$0xff] %v665_v19 }
 0x13f   :  { %v563_v21 = vpop.f32.mrf.mxu2  ;;  %v628_v22 = vpop.f32.mrf.mxu3 }
 0x140   :  { %v564_v23 = vadd.f32 %v563_v21, %v499_v20  ;;  %v436_v24 = vpop.f32.mrf.mxu0  ;;  %v501_v25 = vpop.f32.mrf.mxu1 }
 0x141   :  { %v502_v26 = vadd.f32 %v501_v25, %v436_v24 }
 0x142   :  { %v629_v0 = vadd.f32 %v628_v22, %v564_v23 }
 0x144   :  { %v666_v1 = vmul.f32 11.313708, %v629_v0 }
 0x146   :  { %682 = vst [vmem:[#allocation7 + $0x28] sm:$0xff] %v666_v1 }
 0x147   :  { %v566_v4 = vpop.f32.mrf.mxu2  ;;  %v631_v27 = vpop.f32.mrf.mxu3 }
 0x148   :  { %v567_v28 = vadd.f32 %v566_v4, %v502_v26  ;;  %v439_v29 = vpop.f32.mrf.mxu0  ;;  %v504_v30 = vpop.f32.mrf.mxu1 }
 0x149   :  { %v505_v33 = vadd.f32 %v504_v30, %v439_v29 }
 0x14a   :  { %v632_v31 = vadd.f32 %v631_v27, %v567_v28 }
 0x14c   :  { %v667_v32 = vmul.f32 11.313708, %v632_v31 }
 0x14e   :  { %683 = vst [vmem:[#allocation7 + $0x30] sm:$0xff] %v667_v32 }
 0x14f   :  { %v569_v34 = vpop.f32.mrf.mxu2  ;;  %v634_v35 = vpop.f32.mrf.mxu3 }
 0x150   :  { %v570_v36 = vadd.f32 %v569_v34, %v505_v33  ;;  %v442_v37 = vpop.f32.mrf.mxu0  ;;  %v507_v38 = vpop.f32.mrf.mxu1 }
 0x151   :  { %v508_v41 = vadd.f32 %v507_v38, %v442_v37 }
 0x152   :  { %v635_v39 = vadd.f32 %v634_v35, %v570_v36 }
 0x154   :  { %v668_v40 = vmul.f32 11.313708, %v635_v39 }
 0x156   :  { %684 = vst [vmem:[#allocation7 + $0x38] sm:$0xff] %v668_v40 }
 0x157   :  { %v572_v42 = vpop.f32.mrf.mxu2  ;;  %v637_v43 = vpop.f32.mrf.mxu3 }
 0x158   :  { %v573_v44 = vadd.f32 %v572_v42, %v508_v41  ;;  %v445_v45 = vpop.f32.mrf.mxu0  ;;  %v510_v46 = vpop.f32.mrf.mxu1 }
 0x159   :  { %v511_v49 = vadd.f32 %v510_v46, %v445_v45 }
 0x15a   :  { %v638_v47 = vadd.f32 %v637_v43, %v573_v44 }
 0x15c   :  { %v669_v48 = vmul.f32 11.313708, %v638_v47 }
 0x15e   :  { %685 = vst [vmem:[#allocation7 + $0x40] sm:$0xff] %v669_v48 }
 0x15f   :  { %v575_v50 = vpop.f32.mrf.mxu2  ;;  %v640_v51 = vpop.f32.mrf.mxu3 }
 0x160   :  { %v576_v52 = vadd.f32 %v575_v50, %v511_v49  ;;  %v448_v53 = vpop.f32.mrf.mxu0  ;;  %v513_v54 = vpop.f32.mrf.mxu1 }
 0x161   :  { %v514_v57 = vadd.f32 %v513_v54, %v448_v53 }
 0x162   :  { %v641_v55 = vadd.f32 %v640_v51, %v576_v52 }
 0x164   :  { %v670_v56 = vmul.f32 11.313708, %v641_v55 }
 0x166   :  { %686 = vst [vmem:[#allocation7 + $0x48] sm:$0xff] %v670_v56 }
 0x167   :  { %v578_v58 = vpop.f32.mrf.mxu2  ;;  %v643_v59 = vpop.f32.mrf.mxu3 }
 0x168   :  { %v579_v60 = vadd.f32 %v578_v58, %v514_v57  ;;  %v451_v61 = vpop.f32.mrf.mxu0  ;;  %v516_v62 = vpop.f32.mrf.mxu1 }
 0x169   :  { %v517_v3 = vadd.f32 %v516_v62, %v451_v61 }
 0x16a   :  { %v644_v63 = vadd.f32 %v643_v59, %v579_v60 }
 0x16c   :  { %v671_v2 = vmul.f32 11.313708, %v644_v63 }
 0x16e   :  { %687 = vst [vmem:[#allocation7 + $0x50] sm:$0xff] %v671_v2 }
 0x16f   :  { %v581_v5 = vpop.f32.mrf.mxu2  ;;  %v646_v6 = vpop.f32.mrf.mxu3 }
 0x170   :  { %v582_v7 = vadd.f32 %v581_v5, %v517_v3  ;;  %v454_v8 = vpop.f32.mrf.mxu0  ;;  %v519_v9 = vpop.f32.mrf.mxu1 }
 0x171   :  { %v520_v12 = vadd.f32 %v519_v9, %v454_v8 }
 0x172   :  { %v647_v10 = vadd.f32 %v646_v6, %v582_v7 }
 0x174   :  { %v672_v11 = vmul.f32 11.313708, %v647_v10 }
 0x176   :  { %688 = vst [vmem:[#allocation7 + $0x58] sm:$0xff] %v672_v11 }
 0x177   :  { %v584_v13 = vpop.f32.mrf.mxu2  ;;  %v649_v14 = vpop.f32.mrf.mxu3 }
 0x178   :  { %v585_v15 = vadd.f32 %v584_v13, %v520_v12  ;;  %v457_v16 = vpop.f32.mrf.mxu0  ;;  %v522_v17 = vpop.f32.mrf.mxu1 }
 0x179   :  { %v523_v20 = vadd.f32 %v522_v17, %v457_v16 }
 0x17a   :  { %v650_v18 = vadd.f32 %v649_v14, %v585_v15 }
 0x17c   :  { %v673_v19 = vmul.f32 11.313708, %v650_v18 }
 0x17e   :  { %689 = vst [vmem:[#allocation7 + $0x60] sm:$0xff] %v673_v19 }
 0x17f   :  { %v587_v21 = vpop.f32.mrf.mxu2  ;;  %v652_v22 = vpop.f32.mrf.mxu3 }
 0x180   :  { %v588_v23 = vadd.f32 %v587_v21, %v523_v20  ;;  %v460_v24 = vpop.f32.mrf.mxu0  ;;  %v525_v25 = vpop.f32.mrf.mxu1 }
 0x181   :  { %v526_v26 = vadd.f32 %v525_v25, %v460_v24 }
 0x182   :  { %v653_v0 = vadd.f32 %v652_v22, %v588_v23 }
 0x184   :  { %v674_v1 = vmul.f32 11.313708, %v653_v0 }
 0x186   :  { %690 = vst [vmem:[#allocation7 + $0x68] sm:$0xff] %v674_v1 }
 0x187   :  { %v590_v4 = vpop.f32.mrf.mxu2  ;;  %v655_v27 = vpop.f32.mrf.mxu3 }
 0x188   :  { %v591_v28 = vadd.f32 %v590_v4, %v526_v26  ;;  %v463_v30 = vpop.f32.mrf.mxu0  ;;  %v528_v31 = vpop.f32.mrf.mxu1 }
 0x189   :  { %v529_v33 = vadd.f32 %v528_v31, %v463_v30 }
 0x18a   :  { %v656_v29 = vadd.f32 %v655_v27, %v591_v28 }
 0x18c   :  { %v675_v32 = vmul.f32 11.313708, %v656_v29 }
 0x18e   :  { %691 = vst [vmem:[#allocation7 + $0x70] sm:$0xff] %v675_v32 }
 0x18f   :  { %v593_v34 = vpop.f32.mrf.mxu2  ;;  %v658_v36 = vpop.f32.mrf.mxu3 }
 0x190   :  { %v594_v35 = vadd.f32 %v593_v34, %v529_v33 }
 0x192   :  { %v659_v37 = vadd.f32 %v658_v36, %v594_v35 }
 0x194   :  { %v676_v38 = vmul.f32 11.313708, %v659_v37 }
 0x196   :  { %692 = vst [vmem:[#allocation7 + $0x78] sm:$0xff] %v676_v38 }
 0x197   :  { %705 = dma.vmem_to_hbm [thread:$0]  %s698_s1, 2048, %s700_s23, [#allocation4], %s945_s19, %s945_s19, %s946_s20  }
 0x198   :  { %941 = dma.done.wait [#allocation4], 2048  }
 0x199   :  { %942 = vsyncadd [#allocation4], 4294965248 }
 0x19a   :  { %710 = vsyncpa [#allocation3], 1 }
 0x19b   :  { %711 = vsyncpa [#allocation6], 1 }
 0x19c   :  { %712 = vsyncpa [#allocation4], 1 }

</bundles_post_ra>
